<compile_context>
chip_gen: v6e
topology: v6e:2x2x1
jax: 0.10.0
libtpu: 0.0.40
codegen_flags: <defaults>
</compile_context>

<pallas_src>
import functools

import numpy as np
import jax
import jax.numpy as jnp
from jax.experimental import pallas as pl
from jax.experimental.pallas import tpu as pltpu


LANE = 128


def _round_up(a: int, b: int) -> int:
    return ((a + b - 1) // b) * b


def _adaptive_pool_matrix(in_size: int, out_size: int) -> np.ndarray:
    """(in_size, out_size) matrix P with P[h, i] = 1/count_i if h in window i."""
    P = np.zeros((in_size, out_size), dtype=np.float32)
    for i in range(out_size):
        start = (i * in_size) // out_size
        end = -(-((i + 1) * in_size) // out_size)  # ceil
        P[start:end, i] = 1.0 / (end - start)
    return P


def _physical_vmem_bytes() -> int:
    try:
        info = pltpu.get_tpu_info()
        cap = int(getattr(info, "vmem_capacity_bytes"))
        if cap > 0:
            return cap
    except Exception:
        pass
    return 64 * 1024 * 1024  # conservative default (v7x per-TC size)


def _select_mxu_dtype(x_dtype, p_pad_cols: int):
    """bf16 MXU path for f32 inputs on v5-class chips with long horizons."""
    if x_dtype != jnp.float32 or p_pad_cols < 256:
        return x_dtype
    try:
        kind = jax.devices()[0].device_kind.lower()
    except Exception:
        return x_dtype
    if "v5" in kind:  # f32 matmul on v5e decomposes into many bf16 MXU passes
        return jnp.bfloat16
    return x_dtype


def _flatten_head_kernel(x_ref, p_ref, o_ref, *, mxu_dtype):
    # x_ref: (tile_n, HW), p_ref: (HW, P_pad), o_ref: (tile_n, P_pad)
    x = x_ref[...]
    if x.dtype != mxu_dtype:
        x = x.astype(mxu_dtype)
    o_ref[...] = jnp.dot(
        x, p_ref[...], preferred_element_type=jnp.float32
    ).astype(o_ref.dtype)


def _run_pallas(x_flat, p_mat, *, tile_n, P_pad, mxu_dtype, vmem_limit,
                single_buffer_p):
    N, HW = x_flat.shape
    grid = (pl.cdiv(N, tile_n),)

    p_spec_kwargs = {}
    if single_buffer_p and hasattr(pl, "Buffered"):
        # P's block index is constant across the grid -> one buffer suffices.
        p_spec_kwargs = dict(pipeline_mode=pl.Buffered(1))

    kernel = functools.partial(_flatten_head_kernel, mxu_dtype=mxu_dtype)

    return pl.pallas_call(
        kernel,
        out_shape=jax.ShapeDtypeStruct((N, P_pad), x_flat.dtype),
        grid_spec=pl.GridSpec(
            grid=grid,
            in_specs=[
                # Last dim == full array dim (no 128-pad needed on the input).
                pl.BlockSpec((tile_n, HW), lambda i: (i, 0)),
                pl.BlockSpec((HW, P_pad), lambda i: (0, 0), **p_spec_kwargs),
            ],
            out_specs=pl.BlockSpec((tile_n, P_pad), lambda i: (i, 0)),
        ),
        compiler_params=pltpu.CompilerParams(
            dimension_semantics=("parallel",),
            vmem_limit_bytes=vmem_limit,
        ),
        cost_estimate=pl.CostEstimate(
            flops=2 * N * HW * P_pad,
            transcendentals=0,
            bytes_accessed=(
                N * HW * x_flat.dtype.itemsize          # input read
                + HW * P_pad * p_mat.dtype.itemsize     # P read (once)
                + N * P_pad * x_flat.dtype.itemsize     # output write
            ),
        ),
    )(x_flat, p_mat)


def flatten_head(x: jax.Array, pred_len: int, *, tile_n: int = 2048) -> jax.Array:
    """x: (B, C, H, W) -> (B, C, pred_len) via AdaptiveAvgPool2d((pred_len, 1))."""
    B, C, H, W = x.shape
    N = B * C
    HW = H * W
    itemsize = x.dtype.itemsize

    # Pooling matrix with the 1/W mean folded in.
    P = _adaptive_pool_matrix(H, pred_len) / float(W)   # (H, pred_len)
    P2 = np.repeat(P, W, axis=0)                        # (H*W, pred_len)

    # Pad pred_len (host-side constant only) -> unmasked lane-dense stores.
    P_pad = _round_up(pred_len, LANE)
    if P_pad != pred_len:
        P2 = np.pad(P2, ((0, 0), (0, P_pad - pred_len)))

    # MXU compute dtype (bf16 fast path on v5-class chips for f32/long horizon).
    mxu_dtype = _select_mxu_dtype(x.dtype, P_pad)
    p_mat = jnp.asarray(P2, dtype=mxu_dtype)

    # Flatten input (contiguous reshape: no HBM copy, and no padding at all).
    x_flat = x.reshape(N, HW)

    # --- VMEM budget ------------------------------------------------------
    # Physical VMEM minus ~25% headroom (48 MiB on v7x, 96 MiB on v5e/v6e).
    vmem_limit = max(16 * 1024 * 1024, int(_physical_vmem_bytes() * 0.75))
    p_itemsize = p_mat.dtype.itemsize
    p_bytes = HW * P_pad * p_itemsize                    # single-buffered P
    scratch_reserve = 4 * 1024 * 1024                    # Mosaic internal scratch
    budget = max(0, vmem_limit - p_bytes - scratch_reserve)
    # Per row: double-buffered input tile + double-buffered output tile.
    row_bytes = 2 * HW * itemsize + 2 * P_pad * itemsize

    # Sublane pack for the input dtype (8 f32 / 16 bf16 / 32 int8).
    pack = max(8, 32 // itemsize)

    max_rows = max(pack, budget // max(row_bytes, 1))
    tile_n = min(tile_n, max_rows)
    if N > pack:
        # Keep >= 2 grid steps so the parallel axis spans both v7x TensorCores.
        tile_n = min(tile_n, _round_up(pl.cdiv(N, 2), pack))
    tile_n = min(tile_n, _round_up(N, pack))
    tile_n = max(pack, (tile_n // pack) * pack)

    run = functools.partial(
        _run_pallas, x_flat, p_mat,
        tile_n=tile_n, P_pad=P_pad, mxu_dtype=mxu_dtype, vmem_limit=vmem_limit,
    )
    try:
        out = run(single_buffer_p=True)
    except Exception:
        # Fallback if pipeline_mode=pl.Buffered(1) is rejected by this JAX/Mosaic.
        out = run(single_buffer_p=False)

    return out[:N, :pred_len].reshape(B, C, pred_len)


if __name__ == "__main__":
    # Small deterministic example consistent with the module's forward.
    B, C, H, W = 2, 4, 16, 16
    pred_len = 8

    key = jax.random.PRNGKey(0)
    x = jax.random.normal(key, (B, C, H, W), dtype=jnp.float32)

    out = flatten_head(x, pred_len)
    out = jax.block_until_ready(out)

    # Reference check (plain JAX): adaptive avg pool over (H window, all of W).
    P_ref = jnp.asarray(_adaptive_pool_matrix(H, pred_len))  # (H, pred_len)
    ref = jnp.einsum("bchw,hp->bcp", x, P_ref) / W
    np.testing.assert_allclose(
        np.asarray(out), np.asarray(ref), rtol=1e-5, atol=1e-5
    )

    assert out.shape == (B, C, pred_len)
    print("KERNEL_OK")
</pallas_src>

<mosaic_0001>
module attributes {stable_mosaic.version = 11 : i64} {
  func.func @_flatten_head_kernel(%arg0: i32, %arg1: memref<8x256xf32, #tpu.memory_space<vmem>>, %arg2: memref<256x128xf32, #tpu.memory_space<vmem>>, %arg3: memref<8x128xf32, #tpu.memory_space<vmem>>) attributes {dimension_semantics = [#tpu.dimension_semantics<parallel>], iteration_bounds = array<i64: 1>, scalar_prefetch = 0 : i64, scratch_operands = 0 : i64, tpu.core_type = #tpu.core_type<tc>, window_params = [{transform_indices = @transform_0, window_bounds = array<i64: 8, 256>}, {pipeline_mode = #tpu.pipeline_mode<synchronous>, transform_indices = @transform_1, window_bounds = array<i64: 256, 128>}, {transform_indices = @transform_2, window_bounds = array<i64: 8, 128>}]} {
    %c0 = arith.constant 0 : index
    %c0_0 = arith.constant 0 : index
    %0 = vector.load %arg1[%c0, %c0_0] : memref<8x256xf32, #tpu.memory_space<vmem>>, vector<8x256xf32>
    %c0_1 = arith.constant 0 : index
    %c0_2 = arith.constant 0 : index
    %1 = vector.load %arg2[%c0_1, %c0_2] : memref<256x128xf32, #tpu.memory_space<vmem>>, vector<256x128xf32>
    %cst = arith.constant dense<0.000000e+00> : vector<8x128xf32>
    %2 = tpu.matmul %0, %1, %cst {dimension_numbers = #tpu.dot_dimension_numbers<[1], [0], [0], [1], [0, 0, 1, 1], [], []>} : vector<8x256xf32>, vector<256x128xf32>, vector<8x128xf32> -> vector<8x128xf32>
    %c0_3 = arith.constant 0 : index
    %c0_4 = arith.constant 0 : index
    %3 = vector.load %arg3[%c0_3, %c0_4] : memref<8x128xf32, #tpu.memory_space<vmem>>, vector<8x128xf32>
    tpu.vector_store %arg3[%c0_3, %c0_4], %2 {strides = array<i32>} : memref<8x128xf32, #tpu.memory_space<vmem>>, vector<8x128xf32>,
    return
  }
  func.func @transform_0(%arg0: i32) -> (i32, i32) {
    %c0_i32 = arith.constant 0 : i32
    %c0_i32_0 = arith.constant 0 : i32
    return %arg0, %c0_i32 : i32, i32
  }
  func.func @transform_1(%arg0: i32) -> (i32, i32) {
    %c0_i32 = arith.constant 0 : i32
    %c0_i32_0 = arith.constant 0 : i32
    %c0_i32_1 = arith.constant 0 : i32
    return %c0_i32, %c0_i32_0 : i32, i32
  }
  func.func @transform_2(%arg0: i32) -> (i32, i32) {
    %c0_i32 = arith.constant 0 : i32
    %c0_i32_0 = arith.constant 0 : i32
    return %arg0, %c0_i32 : i32, i32
  }
}

module attributes {stable_mosaic.version = 11 : i64} {
  func.func @_flatten_head_kernel(%arg0: i32, %arg1: memref<8x256xf32, #tpu.memory_space<vmem>>, %arg2: memref<256x128xf32, #tpu.memory_space<vmem>>, %arg3: memref<8x128xf32, #tpu.memory_space<vmem>>) attributes {dimension_semantics = [#tpu.dimension_semantics<parallel>], iteration_bounds = array<i64: 1>, scalar_prefetch = 0 : i64, scratch_operands = 0 : i64, tpu.core_type = #tpu.core_type<tc>, window_params = [{transform_indices = @transform_0, window_bounds = array<i64: 8, 256>}, {pipeline_mode = #tpu.pipeline_mode<synchronous>, transform_indices = @transform_1, window_bounds = array<i64: 256, 128>}, {transform_indices = @transform_2, window_bounds = array<i64: 8, 128>}]} {
    %c0 = arith.constant 0 : index
    %c0_0 = arith.constant 0 : index
    %0 = vector.load %arg1[%c0, %c0_0] : memref<8x256xf32, #tpu.memory_space<vmem>>, vector<8x256xf32>
    %c0_1 = arith.constant 0 : index
    %c0_2 = arith.constant 0 : index
    %1 = vector.load %arg2[%c0_1, %c0_2] : memref<256x128xf32, #tpu.memory_space<vmem>>, vector<256x128xf32>
    %cst = arith.constant dense<0.000000e+00> : vector<8x128xf32>
    %2 = tpu.matmul %0, %1, %cst {dimension_numbers = #tpu.dot_dimension_numbers<[1], [0], [0], [1], [0, 0, 1, 1], [], []>} : vector<8x256xf32>, vector<256x128xf32>, vector<8x128xf32> -> vector<8x128xf32>
    %c0_3 = arith.constant 0 : index
    %c0_4 = arith.constant 0 : index
    %3 = vector.load %arg3[%c0_3, %c0_4] : memref<8x128xf32, #tpu.memory_space<vmem>>, vector<8x128xf32>
    tpu.vector_store %arg3[%c0_3, %c0_4], %2 {strides = array<i32>} : memref<8x128xf32, #tpu.memory_space<vmem>>, vector<8x128xf32>,
    return
  }
  func.func @transform_0(%arg0: i32) -> (i32, i32) {
    %c0_i32 = arith.constant 0 : i32
    %c0_i32_0 = arith.constant 0 : i32
    return %arg0, %c0_i32 : i32, i32
  }
  func.func @transform_1(%arg0: i32) -> (i32, i32) {
    %c0_i32 = arith.constant 0 : i32
    %c0_i32_0 = arith.constant 0 : i32
    %c0_i32_1 = arith.constant 0 : i32
    return %c0_i32, %c0_i32_0 : i32, i32
  }
  func.func @transform_2(%arg0: i32) -> (i32, i32) {
    %c0_i32 = arith.constant 0 : i32
    %c0_i32_0 = arith.constant 0 : i32
    return %arg0, %c0_i32 : i32, i32
  }
}

</mosaic_0001>

<bundles_post_ra>
// kernel: tpu_custom_call.1
= control target key start
LH: loop header
LB: loop body
LE: loop exit
PB: predicated region body
PF: predicated region fallthrough
CT: control target
= control target key end

     0   :  { %7 = vsyncpa [#allocation3], 0  ;;  %s294_s0 = inlined_call_operand.hbm [shape: f32[8,256], index: 0, kind: input, shape index: {}]   ;;  %s295_s1 = inlined_call_operand.hbm [shape: f32[256,128], index: 1, kind: input, shape index: {}]   ;;  %s296_s2 = inlined_call_operand.hbm [shape: f32[8,128], index: 2, kind: output, shape index: {}]  }
   0x1   :  { %8 = vsyncpa [#allocation6], 0 }
   0x2   :  { %9 = vsyncpa [#allocation4], 0  ;;  %s265_s9 = smov [#allocation2]   ;;  %s266_s11 = smov [#allocation5]  }
   0x3   :  { %s16_s10 = sshll.u32 %s265_s9, 4  ;;  %s25_s12 = sshll.u32 %s266_s11, 4  ;;  %s17_s10 = int_to_ptr.vmem [resolvable:$true] %s16_s10  ;;  %s26_s12 = int_to_ptr.vmem [resolvable:$true] %s25_s12 }
   0x4   :  { %s207_s13 = scalar_lea.vmem %s17_s10, 256  ;;  %p212_p1 = scmp.lt.s32.totalorder %s17_s10, %s17_s10 }
   0x5   :  { %p208_p0 = scmp.ne.s32.totalorder %s17_s10, %s207_s13  ;;  %p213_p2 = scmp.lt.s32.totalorder %s207_s13, %s207_s13 }
   0x7   :  { %p214_p3 = por %p213_p2, %p212_p1 }
   0x9   :  { %p215_p4 = pnand %p214_p3, %p208_p0 }
   0xb   :  { %218 = shalt.err (!%p215_p4)
}
   0xc   :  { %19 = dma.hbm_to_vmem [thread:$0]  %s294_s0, 256, %s17_s10, [#allocation3]  }
   0xd   :  { %s227_s16 = scalar_lea.vmem %s26_s12, 4096  ;;  %p232_p6 = scmp.lt.s32.totalorder %s26_s12, %s26_s12 }
   0xe   :  { %p228_p5 = scmp.ne.s32.totalorder %s26_s12, %s227_s16  ;;  %p233_p7 = scmp.lt.s32.totalorder %s227_s16, %s227_s16 }
  0x10   :  { %p234_p8 = por %p233_p7, %p232_p6 }
  0x12   :  { %p235_p9 = pnand %p234_p8, %p228_p5 }
  0x14   :  { %238 = shalt.err (!%p235_p9)
}
  0x15   :  { %s267_s17 = smov 128   ;;  %s268_s18 = smov 8  }
  0x16   :  { %31 = dma.hbm_to_vmem [thread:$0]  %s295_s1, 4096, %s26_s12, [#allocation6], %s267_s17, %s267_s17, %s268_s18  }
  0x17   :  { %259 = dma.done.wait [#allocation3], 256  }
  0x18   :  { %260 = vsyncadd [#allocation3], 4294967040 }
  0x19   :  { %261 = dma.done.wait [#allocation6], 4096  }
  0x1a   :  { %262 = vsyncadd [#allocation6], 4294963200  ;;  %v71_v0 = vld [vmem:[#allocation5 + $0xf8] sm:$0xff]  ;;  %v70_v2 = vld [vmem:[#allocation5 + $0xf0] sm:$0xff]  ;;  %s269_s0 = smov [#allocation7]  }
  0x1b   :  { %v55_v1 = vld [vmem:[#allocation5 + $0x78] sm:$0xff]  ;;  %159 = vmatprep.subr.mxu0 %v71_v0  ;;  %v54_v3 = vld [vmem:[#allocation5 + $0x70] sm:$0xff]  ;;  %v69_v4 = vld [vmem:[#allocation5 + $0xe8] sm:$0xff]  ;;  %s149_s1 = sshll.u32 %s269_s0, 4  ;;  %s150_s1 = int_to_ptr.vmem [resolvable:$true] %s149_s1 }
  0x1c   :  { %160 = vmatpush3.msra.mxu0 %v55_v1  ;;  %v53_v5 = vld [vmem:[#allocation5 + $0x68] sm:$0xff]  ;;  %v68_v6 = vld [vmem:[#allocation5 + $0xe0] sm:$0xff]  ;;  %v67_v8 = vld [vmem:[#allocation5 + $0xd8] sm:$0xff]  ;;  %s239_s21 = scalar_lea.vmem %s150_s1, 128  ;;  %p244_p11 = scmp.lt.s32.totalorder %s150_s1, %s150_s1 }
  0x1d   :  { %161 = vmatprep.subr.mxu0 %v70_v2  ;;  %v52_v7 = vld [vmem:[#allocation5 + $0x60] sm:$0xff]  ;;  %v51_v9 = vld [vmem:[#allocation5 + $0x58] sm:$0xff]  ;;  %v66_v10 = vld [vmem:[#allocation5 + $0xd0] sm:$0xff]  ;;  %p240_p10 = scmp.ne.s32.totalorder %s150_s1, %s239_s21  ;;  %p245_p12 = scmp.lt.s32.totalorder %s239_s21, %s239_s21 }
  0x1e   :  { %162 = vmatpush3.msra.mxu0 %v54_v3  ;;  %v50_v11 = vld [vmem:[#allocation5 + $0x50] sm:$0xff]  ;;  %v65_v12 = vld [vmem:[#allocation5 + $0xc8] sm:$0xff]  ;;  %v39_v13 = vld [vmem:[#allocation2 + $0x8] sm:$0xff] }
  0x1f   :  { %163 = vmatprep.subr.mxu0 %v69_v4  ;;  %v49_v14 = vld [vmem:[#allocation5 + $0x48] sm:$0xff]  ;;  %136 = vmatprep.mubr.f32.mxu0 %v39_v13  ;;  %v64_v15 = vld [vmem:[#allocation5 + $0xc0] sm:$0xff]  ;;  %v63_v17 = vld [vmem:[#allocation5 + $0xb8] sm:$0xff]  ;;  %p246_p13 = por %p245_p12, %p244_p11 }
  0x20   :  { %164 = vmatpush3.msra.mxu0 %v53_v5  ;;  %v48_v16 = vld [vmem:[#allocation5 + $0x40] sm:$0xff]  ;;  %v47_v18 = vld [vmem:[#allocation5 + $0x38] sm:$0xff]  ;;  %v62_v19 = vld [vmem:[#allocation5 + $0xb0] sm:$0xff] }
  0x21   :  { %165 = vmatprep.subr.mxu0 %v68_v6  ;;  %v46_v20 = vld [vmem:[#allocation5 + $0x30] sm:$0xff]  ;;  %v61_v21 = vld [vmem:[#allocation5 + $0xa8] sm:$0xff]  ;;  %v60_v23 = vld [vmem:[#allocation5 + $0xa0] sm:$0xff]  ;;  %p247_p0 = pnand %p246_p13, %p240_p10 }
  0x22   :  { %166 = vmatpush3.msra.mxu0 %v52_v7  ;;  %v45_v22 = vld [vmem:[#allocation5 + $0x28] sm:$0xff]  ;;  %v44_v24 = vld [vmem:[#allocation5 + $0x20] sm:$0xff]  ;;  %v59_v25 = vld [vmem:[#allocation5 + $0x98] sm:$0xff] }
  0x23   :  { %167 = vmatprep.subr.mxu0 %v67_v8  ;;  %v43_v26 = vld [vmem:[#allocation5 + $0x18] sm:$0xff]  ;;  %v58_v27 = vld [vmem:[#allocation5 + $0x90] sm:$0xff]  ;;  %v57_v29 = vld [vmem:[#allocation5 + $0x88] sm:$0xff] }
  0x24   :  { %168 = vmatpush3.msra.mxu0 %v51_v9  ;;  %v42_v28 = vld [vmem:[#allocation5 + $0x10] sm:$0xff]  ;;  %v41_v30 = vld [vmem:[#allocation5 + $0x8] sm:$0xff]  ;;  %v56_v31 = vld [vmem:[#allocation5 + $0x80] sm:$0xff] }
  0x25   :  { %169 = vmatprep.subr.mxu0 %v66_v10  ;;  %v40_v32 = vld [vmem:[#allocation5] sm:$0xff]  ;;  %v38_v33 = vld [vmem:[#allocation2] sm:$0xff] }
  0x26   :  { %170 = vmatpush3.msra.mxu0 %v50_v11 }
  0x27   :  { %171 = vmatprep.subr.mxu0 %v65_v12 }
  0x28   :  { %172 = vmatpush3.msra.mxu0 %v49_v14 }
  0x29   :  { %173 = vmatprep.subr.mxu0 %v64_v15 }
  0x2a   :  { %174 = vmatpush3.msra.mxu0 %v48_v16 }
  0x2b   :  { %175 = vmatprep.subr.mxu0 %v63_v17 }
  0x2c   :  { %176 = vmatpush3.msra.mxu0 %v47_v18 }
  0x2d   :  { %177 = vmatprep.subr.mxu0 %v62_v19 }
  0x2e   :  { %178 = vmatpush3.msra.mxu0 %v46_v20 }
  0x2f   :  { %179 = vmatprep.subr.mxu0 %v61_v21 }
  0x30   :  { %180 = vmatpush3.msra.mxu0 %v45_v22 }
  0x31   :  { %181 = vmatprep.subr.mxu0 %v60_v23 }
  0x32   :  { %182 = vmatpush3.msra.mxu0 %v44_v24 }
  0x33   :  { %183 = vmatprep.subr.mxu0 %v59_v25 }
  0x34   :  { %184 = vmatpush3.msra.mxu0 %v43_v26 }
  0x35   :  { %185 = vmatprep.subr.mxu0 %v58_v27 }
  0x36   :  { %186 = vmatpush3.msra.mxu0 %v42_v28 }
  0x37   :  { %187 = vmatprep.subr.mxu0 %v57_v29 }
  0x38   :  { %188 = vmatpush3.msra.mxu0 %v41_v30 }
  0x39   :  { %189 = vmatprep.subr.mxu0 %v56_v31 }
  0x3a   :  { %190 = vmatpush3.msra.mxu0 %v40_v32 }
  0x3b   :  { %137 = vmatmul.mubr.f32.vlgmr.msra.gmra.mxu0 %v38_v33 }
  0xfb   :  { %v191_v34 = vpop.f32.mrf.mxu0 }
  0xfd   :  { %v192_v35 = vpop.f32.mrf.mxu0 }
  0xfe   :  { %v193_v36 = vadd.f32 %v192_v35, %v191_v34 }
 0x100   :  { %142 = vst [vmem:[#allocation7] sm:$0xff] %v193_v36 }
 0x101   :  { %250 = shalt.err (!%p247_p0)
}
 0x102   :  { %152 = dma.vmem_to_hbm [thread:$0]  %s150_s1, 128, %s296_s2, [#allocation4]  }
 0x103   :  { %263 = dma.done.wait [#allocation4], 128  }
 0x104   :  { %264 = vsyncadd [#allocation4], 4294967168 }
 0x105   :  { %156 = vsyncpa [#allocation3], 1 }
 0x106   :  { %157 = vsyncpa [#allocation6], 1 }
 0x107   :  { %158 = vsyncpa [#allocation4], 1 }

// kernel: tpu_custom_call.1
= control target key start
LH: loop header
LB: loop body
LE: loop exit
PB: predicated region body
PF: predicated region fallthrough
CT: control target
= control target key end

     0   :  { %7 = vsyncpa [#allocation3], 0  ;;  %s294_s0 = inlined_call_operand.hbm [shape: f32[8,256], index: 0, kind: input, shape index: {}]   ;;  %s295_s1 = inlined_call_operand.hbm [shape: f32[256,128], index: 1, kind: input, shape index: {}]   ;;  %s296_s2 = inlined_call_operand.hbm [shape: f32[8,128], index: 2, kind: output, shape index: {}]  }
   0x1   :  { %8 = vsyncpa [#allocation6], 0 }
   0x2   :  { %9 = vsyncpa [#allocation4], 0  ;;  %s265_s9 = smov [#allocation2]   ;;  %s266_s11 = smov [#allocation5]  }
   0x3   :  { %s16_s10 = sshll.u32 %s265_s9, 4  ;;  %s25_s12 = sshll.u32 %s266_s11, 4  ;;  %s17_s10 = int_to_ptr.vmem [resolvable:$true] %s16_s10  ;;  %s26_s12 = int_to_ptr.vmem [resolvable:$true] %s25_s12 }
   0x4   :  { %s207_s13 = scalar_lea.vmem %s17_s10, 256  ;;  %p212_p1 = scmp.lt.s32.totalorder %s17_s10, %s17_s10 }
   0x5   :  { %p208_p0 = scmp.ne.s32.totalorder %s17_s10, %s207_s13  ;;  %p213_p2 = scmp.lt.s32.totalorder %s207_s13, %s207_s13 }
   0x7   :  { %p214_p3 = por %p213_p2, %p212_p1 }
   0x9   :  { %p215_p4 = pnand %p214_p3, %p208_p0 }
   0xb   :  { %218 = shalt.err (!%p215_p4)
}
   0xc   :  { %19 = dma.hbm_to_vmem [thread:$0]  %s294_s0, 256, %s17_s10, [#allocation3]  }
   0xd   :  { %s227_s16 = scalar_lea.vmem %s26_s12, 4096  ;;  %p232_p6 = scmp.lt.s32.totalorder %s26_s12, %s26_s12 }
   0xe   :  { %p228_p5 = scmp.ne.s32.totalorder %s26_s12, %s227_s16  ;;  %p233_p7 = scmp.lt.s32.totalorder %s227_s16, %s227_s16 }
  0x10   :  { %p234_p8 = por %p233_p7, %p232_p6 }
  0x12   :  { %p235_p9 = pnand %p234_p8, %p228_p5 }
  0x14   :  { %238 = shalt.err (!%p235_p9)
}
  0x15   :  { %s267_s17 = smov 128   ;;  %s268_s18 = smov 8  }
  0x16   :  { %31 = dma.hbm_to_vmem [thread:$0]  %s295_s1, 4096, %s26_s12, [#allocation6], %s267_s17, %s267_s17, %s268_s18  }
  0x17   :  { %259 = dma.done.wait [#allocation3], 256  }
  0x18   :  { %260 = vsyncadd [#allocation3], 4294967040 }
  0x19   :  { %261 = dma.done.wait [#allocation6], 4096  }
  0x1a   :  { %262 = vsyncadd [#allocation6], 4294963200  ;;  %v71_v0 = vld [vmem:[#allocation5 + $0xf8] sm:$0xff]  ;;  %v70_v2 = vld [vmem:[#allocation5 + $0xf0] sm:$0xff]  ;;  %s269_s0 = smov [#allocation7]  }
  0x1b   :  { %v55_v1 = vld [vmem:[#allocation5 + $0x78] sm:$0xff]  ;;  %159 = vmatprep.subr.mxu0 %v71_v0  ;;  %v54_v3 = vld [vmem:[#allocation5 + $0x70] sm:$0xff]  ;;  %v69_v4 = vld [vmem:[#allocation5 + $0xe8] sm:$0xff]  ;;  %s149_s1 = sshll.u32 %s269_s0, 4  ;;  %s150_s1 = int_to_ptr.vmem [resolvable:$true] %s149_s1 }
  0x1c   :  { %160 = vmatpush3.msra.mxu0 %v55_v1  ;;  %v53_v5 = vld [vmem:[#allocation5 + $0x68] sm:$0xff]  ;;  %v68_v6 = vld [vmem:[#allocation5 + $0xe0] sm:$0xff]  ;;  %v67_v8 = vld [vmem:[#allocation5 + $0xd8] sm:$0xff]  ;;  %s239_s21 = scalar_lea.vmem %s150_s1, 128  ;;  %p244_p11 = scmp.lt.s32.totalorder %s150_s1, %s150_s1 }
  0x1d   :  { %161 = vmatprep.subr.mxu0 %v70_v2  ;;  %v52_v7 = vld [vmem:[#allocation5 + $0x60] sm:$0xff]  ;;  %v51_v9 = vld [vmem:[#allocation5 + $0x58] sm:$0xff]  ;;  %v66_v10 = vld [vmem:[#allocation5 + $0xd0] sm:$0xff]  ;;  %p240_p10 = scmp.ne.s32.totalorder %s150_s1, %s239_s21  ;;  %p245_p12 = scmp.lt.s32.totalorder %s239_s21, %s239_s21 }
  0x1e   :  { %162 = vmatpush3.msra.mxu0 %v54_v3  ;;  %v50_v11 = vld [vmem:[#allocation5 + $0x50] sm:$0xff]  ;;  %v65_v12 = vld [vmem:[#allocation5 + $0xc8] sm:$0xff]  ;;  %v39_v13 = vld [vmem:[#allocation2 + $0x8] sm:$0xff] }
  0x1f   :  { %163 = vmatprep.subr.mxu0 %v69_v4  ;;  %v49_v14 = vld [vmem:[#allocation5 + $0x48] sm:$0xff]  ;;  %136 = vmatprep.mubr.f32.mxu0 %v39_v13  ;;  %v64_v15 = vld [vmem:[#allocation5 + $0xc0] sm:$0xff]  ;;  %v63_v17 = vld [vmem:[#allocation5 + $0xb8] sm:$0xff]  ;;  %p246_p13 = por %p245_p12, %p244_p11 }
  0x20   :  { %164 = vmatpush3.msra.mxu0 %v53_v5  ;;  %v48_v16 = vld [vmem:[#allocation5 + $0x40] sm:$0xff]  ;;  %v47_v18 = vld [vmem:[#allocation5 + $0x38] sm:$0xff]  ;;  %v62_v19 = vld [vmem:[#allocation5 + $0xb0] sm:$0xff] }
  0x21   :  { %165 = vmatprep.subr.mxu0 %v68_v6  ;;  %v46_v20 = vld [vmem:[#allocation5 + $0x30] sm:$0xff]  ;;  %v61_v21 = vld [vmem:[#allocation5 + $0xa8] sm:$0xff]  ;;  %v60_v23 = vld [vmem:[#allocation5 + $0xa0] sm:$0xff]  ;;  %p247_p0 = pnand %p246_p13, %p240_p10 }
  0x22   :  { %166 = vmatpush3.msra.mxu0 %v52_v7  ;;  %v45_v22 = vld [vmem:[#allocation5 + $0x28] sm:$0xff]  ;;  %v44_v24 = vld [vmem:[#allocation5 + $0x20] sm:$0xff]  ;;  %v59_v25 = vld [vmem:[#allocation5 + $0x98] sm:$0xff] }
  0x23   :  { %167 = vmatprep.subr.mxu0 %v67_v8  ;;  %v43_v26 = vld [vmem:[#allocation5 + $0x18] sm:$0xff]  ;;  %v58_v27 = vld [vmem:[#allocation5 + $0x90] sm:$0xff]  ;;  %v57_v29 = vld [vmem:[#allocation5 + $0x88] sm:$0xff] }
  0x24   :  { %168 = vmatpush3.msra.mxu0 %v51_v9  ;;  %v42_v28 = vld [vmem:[#allocation5 + $0x10] sm:$0xff]  ;;  %v41_v30 = vld [vmem:[#allocation5 + $0x8] sm:$0xff]  ;;  %v56_v31 = vld [vmem:[#allocation5 + $0x80] sm:$0xff] }
  0x25   :  { %169 = vmatprep.subr.mxu0 %v66_v10  ;;  %v40_v32 = vld [vmem:[#allocation5] sm:$0xff]  ;;  %v38_v33 = vld [vmem:[#allocation2] sm:$0xff] }
  0x26   :  { %170 = vmatpush3.msra.mxu0 %v50_v11 }
  0x27   :  { %171 = vmatprep.subr.mxu0 %v65_v12 }
  0x28   :  { %172 = vmatpush3.msra.mxu0 %v49_v14 }
  0x29   :  { %173 = vmatprep.subr.mxu0 %v64_v15 }
  0x2a   :  { %174 = vmatpush3.msra.mxu0 %v48_v16 }
  0x2b   :  { %175 = vmatprep.subr.mxu0 %v63_v17 }
  0x2c   :  { %176 = vmatpush3.msra.mxu0 %v47_v18 }
  0x2d   :  { %177 = vmatprep.subr.mxu0 %v62_v19 }
  0x2e   :  { %178 = vmatpush3.msra.mxu0 %v46_v20 }
  0x2f   :  { %179 = vmatprep.subr.mxu0 %v61_v21 }
  0x30   :  { %180 = vmatpush3.msra.mxu0 %v45_v22 }
  0x31   :  { %181 = vmatprep.subr.mxu0 %v60_v23 }
  0x32   :  { %182 = vmatpush3.msra.mxu0 %v44_v24 }
  0x33   :  { %183 = vmatprep.subr.mxu0 %v59_v25 }
  0x34   :  { %184 = vmatpush3.msra.mxu0 %v43_v26 }
  0x35   :  { %185 = vmatprep.subr.mxu0 %v58_v27 }
  0x36   :  { %186 = vmatpush3.msra.mxu0 %v42_v28 }
  0x37   :  { %187 = vmatprep.subr.mxu0 %v57_v29 }
  0x38   :  { %188 = vmatpush3.msra.mxu0 %v41_v30 }
  0x39   :  { %189 = vmatprep.subr.mxu0 %v56_v31 }
  0x3a   :  { %190 = vmatpush3.msra.mxu0 %v40_v32 }
  0x3b   :  { %137 = vmatmul.mubr.f32.vlgmr.msra.gmra.mxu0 %v38_v33 }
  0xfb   :  { %v191_v34 = vpop.f32.mrf.mxu0 }
  0xfd   :  { %v192_v35 = vpop.f32.mrf.mxu0 }
  0xfe   :  { %v193_v36 = vadd.f32 %v192_v35, %v191_v34 }
 0x100   :  { %142 = vst [vmem:[#allocation7] sm:$0xff] %v193_v36 }
 0x101   :  { %250 = shalt.err (!%p247_p0)
}
 0x102   :  { %152 = dma.vmem_to_hbm [thread:$0]  %s150_s1, 128, %s296_s2, [#allocation4]  }
 0x103   :  { %263 = dma.done.wait [#allocation4], 128  }
 0x104   :  { %264 = vsyncadd [#allocation4], 4294967168 }
 0x105   :  { %156 = vsyncpa [#allocation3], 1 }
 0x106   :  { %157 = vsyncpa [#allocation6], 1 }
 0x107   :  { %158 = vsyncpa [#allocation4], 1 }

</bundles_post_ra>
